<compile_context>
chip_gen: v5e
topology: v5e:2x2
jax: 0.10.0
libtpu: 0.0.40
codegen_flags: <defaults>
</compile_context>

<pallas_src>
import functools

import jax
import jax.numpy as jnp
from jax import lax
from jax.experimental import pallas as pl
from jax.experimental.pallas import tpu as pltpu

_EPS = 1e-5
_LANE = 128
_NEG_BIG = -1e30  # finite "-inf" baked into the padded class lanes of b5


def _round_up(n, m):
    return ((n + m - 1) // m) * m


# ---------------------------------------------------------------------------
# Kernel: fused 5-layer MLP (eval-mode BN pre-folded) + log_softmax.
# ---------------------------------------------------------------------------
def _net_kernel(
    x_ref,
    w1_ref, b1_ref,
    w2_ref, b2_ref,
    w3_ref, b3_ref,
    w4_ref, b4_ref,
    w5_ref, b5_ref,
    o_ref,
):
    h = x_ref[...]  # (TB, C) float32

    def layer(h, w_ref, b_ref, relu):
        # bf16 operands on the MXU, f32 accumulation; bias/ReLU stay f32.
        acc = jnp.dot(h.astype(jnp.bfloat16), w_ref[...],
                      preferred_element_type=jnp.float32) + b_ref[...]
        return jnp.maximum(acc, 0.0) if relu else acc

    h = layer(h, w1_ref, b1_ref, True)       # conv1(k=1)+bn1+relu (pool/dropout = id)
    h = layer(h, w2_ref, b2_ref, True)       # conv2(k=1)+bn2+relu ; flatten
    h = layer(h, w3_ref, b3_ref, True)       # fc1+bn4+relu
    h = layer(h, w4_ref, b4_ref, True)       # fc2+bn5+relu
    logits = layer(h, w5_ref, b5_ref, False) # fc3 ; padded lanes carry -1e30 via b5

    # log_softmax(dim=1).  Padded class lanes hold ~-1e30 (baked into b5), so
    # exp underflows to exactly 0 and the reduction covers the real classes
    # only — no iota / compare / select needed in the kernel.
    m = jnp.max(logits, axis=1, keepdims=True)
    shifted = logits - m
    lse = jnp.log(jnp.sum(jnp.exp(shifted), axis=1, keepdims=True))
    o_ref[...] = (shifted - lse).astype(o_ref.dtype)


# ---------------------------------------------------------------------------
# Parameter construction.
# ---------------------------------------------------------------------------
def make_raw_params(key, num_channels, classes):
    """PyTorch-style uniform(+/- 1/sqrt(fan_in)) weights + default BN params."""
    dims = [(num_channels, 150), (150, 180), (180, 60), (60, 40), (40, classes)]
    params = {}
    ks = jax.random.split(key, 2 * len(dims))
    for i, (fan_in, fan_out) in enumerate(dims):
        bound = 1.0 / float(fan_in) ** 0.5
        # stored already transposed: (fan_in, fan_out) so forward is x @ W
        params[f"w{i + 1}"] = jax.random.uniform(
            ks[2 * i], (fan_in, fan_out), jnp.float32, -bound, bound)
        params[f"b{i + 1}"] = jax.random.uniform(
            ks[2 * i + 1], (1, fan_out), jnp.float32, -bound, bound)
    # BatchNorm default init: gamma=1, beta=0, running_mean=0, running_var=1.
    for idx, feat in zip((1, 2, 3, 4), (150, 180, 60, 40)):
        gamma = jnp.ones((1, feat), jnp.float32)
        beta = jnp.zeros((1, feat), jnp.float32)
        mean = jnp.zeros((1, feat), jnp.float32)
        var = jnp.ones((1, feat), jnp.float32)
        scale = gamma * lax.rsqrt(var + _EPS)
        params[f"s{idx}"] = scale
        params[f"t{idx}"] = beta - mean * scale
    return params


def fold_and_pad_params(raw):
    """Fold eval-mode BN into (w, b), pad fan_out to 128 lanes, bf16 weights.

    The padded class lanes of b5 are set to a large negative finite value so
    the kernel needs no explicit mask before log_softmax.
    """
    out = {}
    for i in range(1, 6):
        w = raw[f"w{i}"]
        b = raw[f"b{i}"]
        if i <= 4:  # layers 1..4 are followed by a BatchNorm
            s = raw[f"s{i}"]
            t = raw[f"t{i}"]
            w = w * s            # (fan_in, fan_out) * (1, fan_out)
            b = b * s + t
        fan_in, fan_out = w.shape
        fi_pad = fan_in if i == 1 else _round_up(fan_in, _LANE)
        fo_pad = _round_up(fan_out, _LANE)
        w_p = jnp.zeros((fi_pad, fo_pad), jnp.float32).at[:fan_in, :fan_out].set(w)
        fill = _NEG_BIG if i == 5 else 0.0
        b_p = jnp.full((1, fo_pad), fill, jnp.float32).at[:, :fan_out].set(b)
        out[f"w{i}"] = w_p.astype(jnp.bfloat16)  # MXU-native operand dtype
        out[f"b{i}"] = b_p                       # bias / elementwise stay f32
    return out


# ---------------------------------------------------------------------------
# Wrapper.
# ---------------------------------------------------------------------------
def _choose_tile_batch(batch):
    """Adaptive batch tile (multiple of 8).

    - batches <= cap: single tile (tiny-batch case stays one grid step).
    - batches  > cap: split into ceil(batch/cap) near-equal tiles, so batches
      just past a tile boundary don't double the padded compute and v7x's two
      TensorCores both get work (grid >= 2).
    - very large batches use a 1024-row cap to amortize per-step overhead
      while staying comfortably inside v7x's 64 MiB VMEM.
    """
    cap = 512 if batch <= 4096 else 1024
    n_tiles = max(1, pl.cdiv(batch, cap))
    return _round_up(pl.cdiv(batch, n_tiles), 8)


@functools.partial(jax.jit, static_argnames=("classes",))
def net_forward(x, params, classes):
    batch, feat = x.shape
    out_pad = params["w5"].shape[1]          # 128-padded class dim

    tb = _choose_tile_batch(batch)
    b_pad = _round_up(batch, tb)
    if b_pad != batch:
        x = jnp.pad(x, ((0, b_pad - batch), (0, 0)))
    grid = (b_pad // tb,)

    weight_args = []
    weight_specs = []
    for i in range(1, 6):
        w = params[f"w{i}"]
        b = params[f"b{i}"]
        weight_args += [w, b]
        # Grid-invariant blocks: VMEM-resident across all grid steps and
        # single-buffered (no pointless double-buffering of constant data).
        weight_specs += [
            pl.BlockSpec(w.shape, lambda i_: (0, 0), pipeline_mode=pl.Buffered(1)),
            pl.BlockSpec(b.shape, lambda i_: (0, 0), pipeline_mode=pl.Buffered(1)),
        ]

    flops = 2 * batch * (feat * 150 + 150 * 180 + 180 * 60 + 60 * 40 + 40 * classes)
    bytes_accessed = (
        sum(int(a.size) * a.dtype.itemsize for a in weight_args)
        + batch * (feat + out_pad) * 4)
    cost = pl.CostEstimate(
        flops=flops, transcendentals=batch * out_pad, bytes_accessed=bytes_accessed)

    out_padded = pl.pallas_call(
        _net_kernel,
        out_shape=jax.ShapeDtypeStruct((b_pad, out_pad), jnp.float32),
        grid=grid,
        in_specs=[pl.BlockSpec((tb, feat), lambda i_: (i_, 0))] + weight_specs,
        out_specs=pl.BlockSpec((tb, out_pad), lambda i_: (i_, 0)),
        compiler_params=pltpu.CompilerParams(dimension_semantics=("parallel",)),
        cost_estimate=cost,
    )(x, *weight_args)

    return out_padded[:batch, :classes]


# ---------------------------------------------------------------------------
# Pure-JAX references for correctness checks.
# ---------------------------------------------------------------------------
def net_forward_ref_matched(x, params, classes):
    """Reference with the kernel's exact precision mix (bf16 MXU operands,
    f32 accumulate/elementwise, folded BN, padded lanes)."""
    h = x
    for i in range(1, 5):
        h = jnp.maximum(
            jnp.dot(h.astype(jnp.bfloat16), params[f"w{i}"],
                    preferred_element_type=jnp.float32) + params[f"b{i}"], 0.0)
    logits = jnp.dot(h.astype(jnp.bfloat16), params["w5"],
                     preferred_element_type=jnp.float32) + params["b5"]
    return jax.nn.log_softmax(logits, axis=1)[:, :classes]


def net_forward_ref_f32(x, raw):
    """Full-f32, unfolded, unpadded reference (module semantics)."""
    h = x
    for i in range(1, 5):
        h = h @ raw[f"w{i}"] + raw[f"b{i}"]
        h = h * raw[f"s{i}"] + raw[f"t{i}"]
        h = jnp.maximum(h, 0.0)
    h = h @ raw["w5"] + raw["b5"]
    return jax.nn.log_softmax(h, axis=1)


if __name__ == "__main__":
    batch, num_channels, classes = 8, 16, 10

    key = jax.random.PRNGKey(0)
    k_x, k_p = jax.random.split(key)
    x = jax.random.normal(k_x, (batch, num_channels), jnp.float32)

    raw = make_raw_params(k_p, num_channels, classes)
    params = fold_and_pad_params(raw)

    out = net_forward(x, params, classes)
    jax.block_until_ready(out)
    assert out.shape == (batch, classes)
    assert bool(jnp.all(jnp.isfinite(out)))

    # Tight check vs a precision-matched pure-JAX reference (same bf16/f32 mix).
    ref_matched = net_forward_ref_matched(x, params, classes)
    assert jnp.allclose(out, ref_matched, atol=1e-4, rtol=1e-4), "mismatch vs matched ref"

    # Loose sanity check vs the full-f32 module reference: bf16 weight storage
    # introduces ~1e-3 level deviations; any semantic bug (BN fold, bias, mask)
    # would be orders of magnitude larger.
    ref_f32 = net_forward_ref_f32(x, raw)
    assert jnp.allclose(out, ref_f32, atol=0.1, rtol=0.1), "mismatch vs f32 ref"

    print("KERNEL_OK")
</pallas_src>

<mosaic_0001>
module attributes {stable_mosaic.version = 11 : i64} {
  func.func @_net_kernel(%arg0: i32, %arg1: memref<8x16xf32, #tpu.memory_space<vmem>>, %arg2: memref<16x256xbf16, #tpu.memory_space<vmem>>, %arg3: memref<1x256xf32, #tpu.memory_space<vmem>>, %arg4: memref<256x256xbf16, #tpu.memory_space<vmem>>, %arg5: memref<1x256xf32, #tpu.memory_space<vmem>>, %arg6: memref<256x128xbf16, #tpu.memory_space<vmem>>, %arg7: memref<1x128xf32, #tpu.memory_space<vmem>>, %arg8: memref<128x128xbf16, #tpu.memory_space<vmem>>, %arg9: memref<1x128xf32, #tpu.memory_space<vmem>>, %arg10: memref<128x128xbf16, #tpu.memory_space<vmem>>, %arg11: memref<1x128xf32, #tpu.memory_space<vmem>>, %arg12: memref<8x128xf32, #tpu.memory_space<vmem>>) attributes {dimension_semantics = [#tpu.dimension_semantics<parallel>], iteration_bounds = array<i64: 1>, scalar_prefetch = 0 : i64, scratch_operands = 0 : i64, tpu.core_type = #tpu.core_type<tc>, window_params = [{transform_indices = @transform_0, window_bounds = array<i64: 8, 16>}, {pipeline_mode = #tpu.pipeline_mode<synchronous>, transform_indices = @transform_1, window_bounds = array<i64: 16, 256>}, {pipeline_mode = #tpu.pipeline_mode<synchronous>, transform_indices = @transform_2, window_bounds = array<i64: 1, 256>}, {pipeline_mode = #tpu.pipeline_mode<synchronous>, transform_indices = @transform_3, window_bounds = array<i64: 256, 256>}, {pipeline_mode = #tpu.pipeline_mode<synchronous>, transform_indices = @transform_4, window_bounds = array<i64: 1, 256>}, {pipeline_mode = #tpu.pipeline_mode<synchronous>, transform_indices = @transform_5, window_bounds = array<i64: 256, 128>}, {pipeline_mode = #tpu.pipeline_mode<synchronous>, transform_indices = @transform_6, window_bounds = array<i64: 1, 128>}, {pipeline_mode = #tpu.pipeline_mode<synchronous>, transform_indices = @transform_7, window_bounds = array<i64: 128, 128>}, {pipeline_mode = #tpu.pipeline_mode<synchronous>, transform_indices = @transform_8, window_bounds = array<i64: 1, 128>}, {pipeline_mode = #tpu.pipeline_mode<synchronous>, transform_indices = @transform_9, window_bounds = array<i64: 128, 128>}, {pipeline_mode = #tpu.pipeline_mode<synchronous>, transform_indices = @transform_10, window_bounds = array<i64: 1, 128>}, {transform_indices = @transform_11, window_bounds = array<i64: 8, 128>}]} {
    %c0 = arith.constant 0 : index
    %c0_0 = arith.constant 0 : index
    %0 = vector.load %arg1[%c0, %c0_0] : memref<8x16xf32, #tpu.memory_space<vmem>>, vector<8x16xf32>
    %1 = arith.truncf %0 : vector<8x16xf32> to vector<8x16xbf16>
    %c0_1 = arith.constant 0 : index
    %c0_2 = arith.constant 0 : index
    %2 = vector.load %arg2[%c0_1, %c0_2] : memref<16x256xbf16, #tpu.memory_space<vmem>>, vector<16x256xbf16>
    %cst = arith.constant dense<0.000000e+00> : vector<8x256xf32>
    %3 = tpu.matmul %1, %2, %cst {dimension_numbers = #tpu.dot_dimension_numbers<[1], [0], [0], [1], [0, 0, 1, 1], [], []>} : vector<8x16xbf16>, vector<16x256xbf16>, vector<8x256xf32> -> vector<8x256xf32>
    %c0_3 = arith.constant 0 : index
    %c0_4 = arith.constant 0 : index
    %4 = vector.load %arg3[%c0_3, %c0_4] : memref<1x256xf32, #tpu.memory_space<vmem>>, vector<1x256xf32>
    %5 = vector.broadcast %4 : vector<1x256xf32> to vector<8x256xf32>
    %6 = arith.addf %3, %5 : vector<8x256xf32>
    %cst_5 = arith.constant 0.000000e+00 : f32
    %7 = vector.broadcast %cst_5 : f32 to vector<8x256xf32>
    %8 = arith.maximumf %6, %7 : vector<8x256xf32>
    %9 = arith.truncf %8 : vector<8x256xf32> to vector<8x256xbf16>
    %c0_6 = arith.constant 0 : index
    %c0_7 = arith.constant 0 : index
    %10 = vector.load %arg4[%c0_6, %c0_7] : memref<256x256xbf16, #tpu.memory_space<vmem>>, vector<256x256xbf16>
    %cst_8 = arith.constant dense<0.000000e+00> : vector<8x256xf32>
    %11 = tpu.matmul %9, %10, %cst_8 {dimension_numbers = #tpu.dot_dimension_numbers<[1], [0], [0], [1], [0, 0, 1, 1], [], []>} : vector<8x256xbf16>, vector<256x256xbf16>, vector<8x256xf32> -> vector<8x256xf32>
    %c0_9 = arith.constant 0 : index
    %c0_10 = arith.constant 0 : index
    %12 = vector.load %arg5[%c0_9, %c0_10] : memref<1x256xf32, #tpu.memory_space<vmem>>, vector<1x256xf32>
    %13 = vector.broadcast %12 : vector<1x256xf32> to vector<8x256xf32>
    %14 = arith.addf %11, %13 : vector<8x256xf32>
    %cst_11 = arith.constant 0.000000e+00 : f32
    %15 = vector.broadcast %cst_11 : f32 to vector<8x256xf32>
    %16 = arith.maximumf %14, %15 : vector<8x256xf32>
    %17 = arith.truncf %16 : vector<8x256xf32> to vector<8x256xbf16>
    %c0_12 = arith.constant 0 : index
    %c0_13 = arith.constant 0 : index
    %18 = vector.load %arg6[%c0_12, %c0_13] : memref<256x128xbf16, #tpu.memory_space<vmem>>, vector<256x128xbf16>
    %cst_14 = arith.constant dense<0.000000e+00> : vector<8x128xf32>
    %19 = tpu.matmul %17, %18, %cst_14 {dimension_numbers = #tpu.dot_dimension_numbers<[1], [0], [0], [1], [0, 0, 1, 1], [], []>} : vector<8x256xbf16>, vector<256x128xbf16>, vector<8x128xf32> -> vector<8x128xf32>
    %c0_15 = arith.constant 0 : index
    %c0_16 = arith.constant 0 : index
    %20 = vector.load %arg7[%c0_15, %c0_16] : memref<1x128xf32, #tpu.memory_space<vmem>>, vector<1x128xf32>
    %21 = vector.broadcast %20 : vector<1x128xf32> to vector<8x128xf32>
    %22 = arith.addf %19, %21 : vector<8x128xf32>
    %cst_17 = arith.constant 0.000000e+00 : f32
    %23 = vector.broadcast %cst_17 : f32 to vector<8x128xf32>
    %24 = arith.maximumf %22, %23 : vector<8x128xf32>
    %25 = arith.truncf %24 : vector<8x128xf32> to vector<8x128xbf16>
    %c0_18 = arith.constant 0 : index
    %c0_19 = arith.constant 0 : index
    %26 = vector.load %arg8[%c0_18, %c0_19] : memref<128x128xbf16, #tpu.memory_space<vmem>>, vector<128x128xbf16>
    %cst_20 = arith.constant dense<0.000000e+00> : vector<8x128xf32>
    %27 = tpu.matmul %25, %26, %cst_20 {dimension_numbers = #tpu.dot_dimension_numbers<[1], [0], [0], [1], [0, 0, 1, 1], [], []>} : vector<8x128xbf16>, vector<128x128xbf16>, vector<8x128xf32> -> vector<8x128xf32>
    %c0_21 = arith.constant 0 : index
    %c0_22 = arith.constant 0 : index
    %28 = vector.load %arg9[%c0_21, %c0_22] : memref<1x128xf32, #tpu.memory_space<vmem>>, vector<1x128xf32>
    %29 = vector.broadcast %28 : vector<1x128xf32> to vector<8x128xf32>
    %30 = arith.addf %27, %29 : vector<8x128xf32>
    %cst_23 = arith.constant 0.000000e+00 : f32
    %31 = vector.broadcast %cst_23 : f32 to vector<8x128xf32>
    %32 = arith.maximumf %30, %31 : vector<8x128xf32>
    %33 = arith.truncf %32 : vector<8x128xf32> to vector<8x128xbf16>
    %c0_24 = arith.constant 0 : index
    %c0_25 = arith.constant 0 : index
    %34 = vector.load %arg10[%c0_24, %c0_25] : memref<128x128xbf16, #tpu.memory_space<vmem>>, vector<128x128xbf16>
    %cst_26 = arith.constant dense<0.000000e+00> : vector<8x128xf32>
    %35 = tpu.matmul %33, %34, %cst_26 {dimension_numbers = #tpu.dot_dimension_numbers<[1], [0], [0], [1], [0, 0, 1, 1], [], []>} : vector<8x128xbf16>, vector<128x128xbf16>, vector<8x128xf32> -> vector<8x128xf32>
    %c0_27 = arith.constant 0 : index
    %c0_28 = arith.constant 0 : index
    %36 = vector.load %arg11[%c0_27, %c0_28] : memref<1x128xf32, #tpu.memory_space<vmem>>, vector<1x128xf32>
    %37 = vector.broadcast %36 : vector<1x128xf32> to vector<8x128xf32>
    %38 = arith.addf %35, %37 : vector<8x128xf32>
    %cst_29 = arith.constant dense<0xFF800000> : vector<8xf32>
    %39 = vector.multi_reduction <maximumf>, %38, %cst_29 [1] : vector<8x128xf32> to vector<8xf32>
    %40 = vector.shape_cast %39 : vector<8xf32> to vector<8x1xf32>
    %41 = vector.broadcast %40 : vector<8x1xf32> to vector<8x128xf32>
    %42 = arith.subf %38, %41 : vector<8x128xf32>
    %43 = math.exp %42 : vector<8x128xf32>
    %cst_30 = arith.constant dense<0.000000e+00> : vector<8xf32>
    %44 = vector.multi_reduction <add>, %43, %cst_30 [1] : vector<8x128xf32> to vector<8xf32>
    %45 = vector.shape_cast %44 : vector<8xf32> to vector<8x1xf32>
    %46 = math.log %45 : vector<8x1xf32>
    %47 = vector.broadcast %46 : vector<8x1xf32> to vector<8x128xf32>
    %48 = arith.subf %42, %47 : vector<8x128xf32>
    %c0_31 = arith.constant 0 : index
    %c0_32 = arith.constant 0 : index
    %49 = vector.load %arg12[%c0_31, %c0_32] : memref<8x128xf32, #tpu.memory_space<vmem>>, vector<8x128xf32>
    tpu.vector_store %arg12[%c0_31, %c0_32], %48 {strides = array<i32>} : memref<8x128xf32, #tpu.memory_space<vmem>>, vector<8x128xf32>,
    return
  }
  func.func @transform_0(%arg0: i32) -> (i32, i32) {
    %c0_i32 = arith.constant 0 : i32
    %c0_i32_0 = arith.constant 0 : i32
    return %arg0, %c0_i32 : i32, i32
  }
  func.func @transform_1(%arg0: i32) -> (i32, i32) {
    %c0_i32 = arith.constant 0 : i32
    %c0_i32_0 = arith.constant 0 : i32
    %c0_i32_1 = arith.constant 0 : i32
    return %c0_i32, %c0_i32_0 : i32, i32
  }
  func.func @transform_2(%arg0: i32) -> (i32, i32) {
    %c0_i32 = arith.constant 0 : i32
    %c0_i32_0 = arith.constant 0 : i32
    %c0_i32_1 = arith.constant 0 : i32
    return %c0_i32, %c0_i32_0 : i32, i32
  }
  func.func @transform_3(%arg0: i32) -> (i32, i32) {
    %c0_i32 = arith.constant 0 : i32
    %c0_i32_0 = arith.constant 0 : i32
    %c0_i32_1 = arith.constant 0 : i32
    return %c0_i32, %c0_i32_0 : i32, i32
  }
  func.func @transform_4(%arg0: i32) -> (i32, i32) {
    %c0_i32 = arith.constant 0 : i32
    %c0_i32_0 = arith.constant 0 : i32
    %c0_i32_1 = arith.constant 0 : i32
    return %c0_i32, %c0_i32_0 : i32, i32
  }
  func.func @transform_5(%arg0: i32) -> (i32, i32) {
    %c0_i32 = arith.constant 0 : i32
    %c0_i32_0 = arith.constant 0 : i32
    %c0_i32_1 = arith.constant 0 : i32
    return %c0_i32, %c0_i32_0 : i32, i32
  }
  func.func @transform_6(%arg0: i32) -> (i32, i32) {
    %c0_i32 = arith.constant 0 : i32
    %c0_i32_0 = arith.constant 0 : i32
    %c0_i32_1 = arith.constant 0 : i32
    return %c0_i32, %c0_i32_0 : i32, i32
  }
  func.func @transform_7(%arg0: i32) -> (i32, i32) {
    %c0_i32 = arith.constant 0 : i32
    %c0_i32_0 = arith.constant 0 : i32
    %c0_i32_1 = arith.constant 0 : i32
    return %c0_i32, %c0_i32_0 : i32, i32
  }
  func.func @transform_8(%arg0: i32) -> (i32, i32) {
    %c0_i32 = arith.constant 0 : i32
    %c0_i32_0 = arith.constant 0 : i32
    %c0_i32_1 = arith.constant 0 : i32
    return %c0_i32, %c0_i32_0 : i32, i32
  }
  func.func @transform_9(%arg0: i32) -> (i32, i32) {
    %c0_i32 = arith.constant 0 : i32
    %c0_i32_0 = arith.constant 0 : i32
    %c0_i32_1 = arith.constant 0 : i32
    return %c0_i32, %c0_i32_0 : i32, i32
  }
  func.func @transform_10(%arg0: i32) -> (i32, i32) {
    %c0_i32 = arith.constant 0 : i32
    %c0_i32_0 = arith.constant 0 : i32
    %c0_i32_1 = arith.constant 0 : i32
    return %c0_i32, %c0_i32_0 : i32, i32
  }
  func.func @transform_11(%arg0: i32) -> (i32, i32) {
    %c0_i32 = arith.constant 0 : i32
    %c0_i32_0 = arith.constant 0 : i32
    return %arg0, %c0_i32 : i32, i32
  }
}

</mosaic_0001>

<bundles_post_ra>
// kernel: net_forward.1
= control target key start
LH: loop header
LB: loop body
LE: loop exit
PB: predicated region body
PF: predicated region fallthrough
CT: control target
= control target key end

     0   :  { %16 = vsyncpa [#allocation3], 0  ;;  %s1523_s0 = inlined_call_operand.hbm [shape: f32[8,16], index: 0, kind: input, shape index: {}]   ;;  %s1524_s1 = inlined_call_operand.hbm [shape: bf16[16,256], index: 1, kind: input, shape index: {}]   ;;  %s1525_s2 = inlined_call_operand.hbm [shape: f32[1,256], index: 2, kind: input, shape index: {}]   ;;  %s1526_s3 = inlined_call_operand.hbm [shape: bf16[256,256], index: 3, kind: input, shape index: {}]   ;;  %s1527_s4 = inlined_call_operand.hbm [shape: f32[1,256], index: 4, kind: input, shape index: {}]   ;;  %s1528_s5 = inlined_call_operand.hbm [shape: bf16[256,128], index: 5, kind: input, shape index: {}]   ;;  %s1529_s6 = inlined_call_operand.vmem [shape: f32[1,128], index: 6, kind: input, shape index: {}]   ;;  %s1530_s7 = inlined_call_operand.hbm [shape: bf16[128,128], index: 7, kind: input, shape index: {}]   ;;  %s1531_s8 = inlined_call_operand.vmem [shape: f32[1,128], index: 8, kind: input, shape index: {}]   ;;  %s1532_s9 = inlined_call_operand.hbm [shape: bf16[128,128], index: 9, kind: input, shape index: {}]   ;;  %s1533_s10 = inlined_call_operand.vmem [shape: f32[1,128], index: 10, kind: input, shape index: {}]   ;;  %s1534_s11 = inlined_call_operand.hbm [shape: f32[8,128], index: 11, kind: output, shape index: {}]  }
   0x1   :  { %17 = vsyncpa [#allocation6], 0 }
   0x2   :  { %18 = vsyncpa [#allocation9], 0 }
   0x3   :  { %19 = vsyncpa [#allocation12], 0 }
   0x4   :  { %20 = vsyncpa [#allocation15], 0  ;;  %s37_s19 = sshll.u32 %s1524_s1, 4  ;;  %s38_s19 = int_to_ptr.hbm [resolvable:$true] %s37_s19 }
   0x5   :  { %21 = vsyncpa [#allocation4], 0  ;;  %s1403_s20 = smov [#allocation5]   ;;  %s61_s24 = sshll.u32 %s1526_s3, 4  ;;  %s62_s24 = int_to_ptr.hbm [resolvable:$true] %s61_s24 }
   0x6   :  { %s39_s21 = sshll.u32 %s1403_s20, 4  ;;  %s1404_s25 = smov 128   ;;  %s40_s21 = int_to_ptr.vmem [resolvable:$true] %s39_s21 }
   0x7   :  { %s1405_s26 = smov 8   ;;  %s1406_s27 = smov [#allocation8]  }
   0x8   :  { %45 = dma.hbm_to_vmem [thread:$0]  %s38_s19, 256, %s40_s21, [#allocation6], %s1404_s25, %s1404_s25, %s1405_s26  }
   0x9   :  { %s63_s28 = sshll.u32 %s1406_s27, 4  ;;  %s85_s12 = sshll.u32 %s1528_s5, 4  ;;  %s64_s28 = int_to_ptr.vmem [resolvable:$true] %s63_s28  ;;  %s86_s12 = int_to_ptr.hbm [resolvable:$true] %s85_s12 }
   0xa   :  { %69 = dma.hbm_to_vmem [thread:$0]  %s62_s24, 4096, %s64_s28, [#allocation9], %s1404_s25, %s1404_s25, %s1405_s26  }
   0xb   :  { %s1407_s1 = smov [#allocation11]   ;;  %s27_s3 = sshll.u32 %s1523_s0, 4  ;;  %s28_s3 = int_to_ptr.hbm [resolvable:$true] %s27_s3 }
   0xc   :  { %s87_s13 = sshll.u32 %s1407_s1, 4  ;;  %s1408_s16 = smov 64   ;;  %s88_s13 = int_to_ptr.vmem [resolvable:$true] %s87_s13 }
   0xd   :  { %s1409_s17 = smov 4   ;;  %s1410_s18 = smov [#allocation2]  }
   0xe   :  { %93 = dma.hbm_to_vmem [thread:$0]  %s86_s12, 2048, %s88_s13, [#allocation12], %s1408_s16, %s1408_s16, %s1409_s17  }
   0xf   :  { %s29_s19 = sshll.u32 %s1410_s18, 4  ;;  %s51_s21 = sshll.u32 %s1525_s2, 4  ;;  %s30_s19 = int_to_ptr.vmem [resolvable:$true] %s29_s19  ;;  %s52_s21 = int_to_ptr.hbm [resolvable:$true] %s51_s21 }
  0x10   :  { %32 = dma.hbm_to_vmem [thread:$0]  %s28_s3, 128, %s30_s19, [#allocation3]  }
  0x11   :  { %s75_s0 = sshll.u32 %s1527_s4, 4  ;;  %s1411_s24 = smov [#allocation7]   ;;  %s76_s0 = int_to_ptr.hbm [resolvable:$true] %s75_s0 }
  0x12   :  { %s53_s25 = sshll.u32 %s1411_s24, 4  ;;  %s1412_s26 = smov [#allocation10]   ;;  %s54_s25 = int_to_ptr.vmem [resolvable:$true] %s53_s25 }
  0x13   :  { %56 = dma.hbm_to_vmem [thread:$0]  %s52_s21, 32, %s54_s25, [#allocation6]  }
  0x14   :  { %s77_s27 = sshll.u32 %s1412_s26, 4  ;;  %s100_s30 = sshll.u32 %s1530_s7, 4  ;;  %s78_s27 = int_to_ptr.vmem [resolvable:$true] %s77_s27  ;;  %s101_s30 = int_to_ptr.hbm [resolvable:$true] %s100_s30 }
  0x15   :  { %80 = dma.hbm_to_vmem [thread:$0]  %s76_s0, 32, %s78_s27, [#allocation9]  }
  0x16   :  { %s115_s1 = sshll.u32 %s1532_s9, 4  ;;  %s1413_s13 = smov [#allocation13]   ;;  %s116_s1 = int_to_ptr.hbm [resolvable:$true] %s115_s1 }
  0x17   :  { %s102_s4 = sshll.u32 %s1413_s13, 4  ;;  %s1414_s14 = smov [#allocation14]   ;;  %s103_s4 = int_to_ptr.vmem [resolvable:$true] %s102_s4 }
  0x18   :  { %108 = dma.hbm_to_vmem [thread:$0]  %s101_s30, 1024, %s103_s4, [#allocation12], %s1408_s16, %s1408_s16, %s1409_s17  }
  0x19   :  { %s117_s15 = sshll.u32 %s1414_s14, 4  ;;  %s118_s15 = int_to_ptr.vmem [resolvable:$true] %s117_s15 }
  0x1a   :  { %123 = dma.hbm_to_vmem [thread:$0]  %s116_s1, 1024, %s118_s15, [#allocation15], %s1408_s16, %s1408_s16, %s1409_s17  }
  0x1b   :  { %1391 = dma.done.wait [#allocation3], 128  }
  0x1c   :  { %1392 = vsyncadd [#allocation3], 4294967168 }
  0x1d   :  { %1393 = dma.done.wait [#allocation6], 288  }
  0x1e   :  { %1394 = vsyncadd [#allocation6], 4294967008 }
  0x1f   :  { %1395 = dma.done.wait [#allocation9], 4128  }
  0x20   :  { %1396 = vsyncadd [#allocation9], 4294963168 }
  0x21   :  { %1397 = dma.done.wait [#allocation12], 3072  }
  0x22   :  { %1398 = vsyncadd [#allocation12], 4294964224 }
  0x23   :  { %1399 = dma.done.wait [#allocation15], 1024  }
  0x24   :  { %1400 = vsyncadd [#allocation15], 4294966272  ;;  %v825_v0 = vld [vmem:[#allocation5] sm:$0xf]  ;;  %v1090_v1 = vld [vmem:[#allocation5 + $0x4] sm:$0xf0] }
  0x25   :  { %v1089_v2 = vld [vmem:[#allocation5 + $0x4] sm:$0xf]  ;;  %v826_v3 = vor.u32 %v1090_v1, %v825_v0  ;;  %v827_v4 = vld [vmem:[#allocation5 + $0x8] sm:$0xf0]  ;;  %v159_v5 = vld [vmem:[#allocation2] sm:$0xff]  ;;  %vm179_vm0 = vcmask 130048  }
  0x26   :  { %v891_v6 = vld [vmem:[#allocation8 + $0x70] sm:$0xf]  ;;  %v830_v7 = vor.u32 %v1089_v2, %v827_v4  ;;  %v160_v8 = vpack.c.bf16 %v159_v5, %v159_v5  ;;  %v1106_v9 = vld [vmem:[#allocation8 + $0x74] sm:$0xf0]  ;;  %v1105_v14 = vld [vmem:[#allocation8 + $0x74] sm:$0xf] }
  0x27   :  { %v955_v10 = vld [vmem:[#allocation8 + $0xf0] sm:$0xf]  ;;  %v1122_v11 = vld [vmem:[#allocation8 + $0xf4] sm:$0xf0]  ;;  %190 = vmatpush.bf16.msra.mxu0 %v826_v3  ;;  %v892_v12 = vor.u32 %v1106_v9, %v891_v6  ;;  %v893_v15 = vld [vmem:[#allocation8 + $0x78] sm:$0xf0] }
  0x28   :  { %v956_v13 = vor.u32 %v1122_v11, %v955_v10  ;;  %v1121_v16 = vld [vmem:[#allocation8 + $0xf4] sm:$0xf]  ;;  %203 = vmatpush.bf16.msra.mxu1 %v830_v7  ;;  %v896_v17 = vor.u32 %v1105_v14, %v893_v15  ;;  %v957_v18 = vld [vmem:[#allocation8 + $0xf8] sm:$0xf0]  ;;  %v883_v19 = vld [vmem:[#allocation8 + $0x60] sm:$0xf] }
  0x29   :  { %v1104_v20 = vld [vmem:[#allocation8 + $0x64] sm:$0xf0]  ;;  %411 = vmatpush.bf16.msra.mxu2 %v892_v12  ;;  %v960_v21 = vor.u32 %v1121_v16, %v957_v18  ;;  %v947_v23 = vld [vmem:[#allocation8 + $0xe0] sm:$0xf]  ;;  %v1103_v25 = vld [vmem:[#allocation8 + $0x64] sm:$0xf] }
  0x2a   :  { %424 = vmatpush.bf16.msra.mxu3 %v956_v13  ;;  %v884_v22 = vor.u32 %v1104_v20, %v883_v19  ;;  %v1120_v24 = vld [vmem:[#allocation8 + $0xe4] sm:$0xf0]  ;;  %831 = vmatmul.msk.bf16.vlgmr.msra.gmra.mxu0 %vm179_vm0, %v160_v8  ;;  %v885_v27 = vld [vmem:[#allocation8 + $0x68] sm:$0xf0]  ;;  %v1119_v28 = vld [vmem:[#allocation8 + $0xe4] sm:$0xf] }
  0x2b   :  { %v948_v26 = vor.u32 %v1120_v24, %v947_v23  ;;  %v949_v29 = vld [vmem:[#allocation8 + $0xe8] sm:$0xf0]  ;;  %832 = vmatmul.msk.bf16.vlgmr.msra.gmra.mxu1 %vm179_vm0, %v160_v8  ;;  %437 = vmatpush.bf16.msrb.mxu0 %v896_v17  ;;  %v888_v30 = vor.u32 %v1103_v25, %v885_v27  ;;  %v875_v31 = vld [vmem:[#allocation8 + $0x50] sm:$0xf]  ;;  %v1102_v32 = vld [vmem:[#allocation8 + $0x54] sm:$0xf0] }
  0x2c   :  { %v939_v33 = vld [vmem:[#allocation8 + $0xd0] sm:$0xf]  ;;  %450 = vmatpush.bf16.msrb.mxu1 %v960_v21  ;;  %v952_v34 = vor.u32 %v1119_v28, %v949_v29  ;;  %v1118_v35 = vld [vmem:[#allocation8 + $0xd4] sm:$0xf0]  ;;  %v1101_v36 = vld [vmem:[#allocation8 + $0x54] sm:$0xf]  ;;  %v876_v38 = vor.u32 %v1102_v32, %v875_v31 }
  0x2d   :  { %v877_v37 = vld [vmem:[#allocation8 + $0x58] sm:$0xf0]  ;;  %412 = vmatpush.bf16.msra.mxu2 %v884_v22  ;;  %v940_v39 = vor.u32 %v1118_v35, %v939_v33  ;;  %v1117_v40 = vld [vmem:[#allocation8 + $0xd4] sm:$0xf]  ;;  %v867_v42 = vld [vmem:[#allocation8 + $0x40] sm:$0xf] }
  0x2e   :  { %425 = vmatpush.bf16.msra.mxu3 %v948_v26  ;;  %v941_v41 = vld [vmem:[#allocation8 + $0xd8] sm:$0xf0]  ;;  %v1100_v43 = vld [vmem:[#allocation8 + $0x44] sm:$0xf0]  ;;  %v931_v44 = vld [vmem:[#allocation8 + $0xc0] sm:$0xf]  ;;  %v880_v46 = vor.u32 %v1101_v36, %v877_v37 }
  0x2f   :  { %v1116_v45 = vld [vmem:[#allocation8 + $0xc4] sm:$0xf0]  ;;  %438 = vmatpush.bf16.msrb.mxu0 %v888_v30  ;;  %v944_v47 = vor.u32 %v1117_v40, %v941_v41  ;;  %v1099_v48 = vld [vmem:[#allocation8 + $0x44] sm:$0xf]  ;;  %v869_v49 = vld [vmem:[#allocation8 + $0x48] sm:$0xf0]  ;;  %v868_v50 = vor.u32 %v1100_v43, %v867_v42 }
  0x30   :  { %451 = vmatpush.bf16.msrb.mxu1 %v952_v34  ;;  %v932_v51 = vor.u32 %v1116_v45, %v931_v44  ;;  %v1115_v52 = vld [vmem:[#allocation8 + $0xc4] sm:$0xf]  ;;  %v933_v53 = vld [vmem:[#allocation8 + $0xc8] sm:$0xf0]  ;;  %v859_v54 = vld [vmem:[#allocation8 + $0x30] sm:$0xf]  ;;  %v872_v58 = vor.u32 %v1099_v48, %v869_v49 }
  0x31   :  { %413 = vmatpush.bf16.msra.mxu2 %v876_v38  ;;  %v1098_v55 = vld [vmem:[#allocation8 + $0x34] sm:$0xf0]  ;;  %v923_v56 = vld [vmem:[#allocation8 + $0xb0] sm:$0xf]  ;;  %v1097_v59 = vld [vmem:[#allocation8 + $0x34] sm:$0xf]  ;;  %v936_v60 = vor.u32 %v1115_v52, %v933_v53 }
  0x32   :  { %426 = vmatpush.bf16.msra.mxu3 %v940_v39  ;;  %v1114_v57 = vld [vmem:[#allocation8 + $0xb4] sm:$0xf0]  ;;  %v861_v61 = vld [vmem:[#allocation8 + $0x38] sm:$0xf0]  ;;  %v1113_v62 = vld [vmem:[#allocation8 + $0xb4] sm:$0xf]  ;;  %v860_v0 = vor.u32 %v1098_v55, %v859_v54 }
  0x33   :  { %439 = vmatpush.bf16.msrb.mxu0 %v880_v46  ;;  %v925_v63 = vld [vmem:[#allocation8 + $0xb8] sm:$0xf0]  ;;  %v924_v1 = vor.u32 %v1114_v57, %v923_v56  ;;  %v851_v2 = vld [vmem:[#allocation8 + $0x20] sm:$0xf]  ;;  %v1096_v3 = vld [vmem:[#allocation8 + $0x24] sm:$0xf0]  ;;  %v864_v6 = vor.u32 %v1097_v59, %v861_v61 }
  0x34   :  { %452 = vmatpush.bf16.msrb.mxu1 %v944_v47  ;;  %v915_v4 = vld [vmem:[#allocation8 + $0xa0] sm:$0xf]  ;;  %v1112_v5 = vld [vmem:[#allocation8 + $0xa4] sm:$0xf0]  ;;  %v928_v7 = vor.u32 %v1113_v62, %v925_v63  ;;  %v1095_v8 = vld [vmem:[#allocation8 + $0x24] sm:$0xf]  ;;  %v852_v10 = vor.u32 %v1096_v3, %v851_v2 }
  0x35   :  { %414 = vmatpush.bf16.msra.mxu2 %v868_v50  ;;  %v853_v9 = vld [vmem:[#allocation8 + $0x28] sm:$0xf0]  ;;  %v916_v11 = vor.u32 %v1112_v5, %v915_v4  ;;  %v1111_v12 = vld [vmem:[#allocation8 + $0xa4] sm:$0xf]  ;;  %v843_v16 = vld [vmem:[#allocation8 + $0x10] sm:$0xf] }
  0x36   :  { %427 = vmatpush.bf16.msra.mxu3 %v932_v51  ;;  %v917_v13 = vld [vmem:[#allocation8 + $0xa8] sm:$0xf0]  ;;  %v856_v14 = vor.u32 %v1095_v8, %v853_v9  ;;  %v1094_v17 = vld [vmem:[#allocation8 + $0x14] sm:$0xf0]  ;;  %v907_v18 = vld [vmem:[#allocation8 + $0x90] sm:$0xf] }
  0x37   :  { %440 = vmatpush.bf16.msrb.mxu0 %v872_v58  ;;  %v920_v15 = vor.u32 %v1111_v12, %v917_v13  ;;  %v844_v19 = vor.u32 %v1094_v17, %v843_v16  ;;  %v1110_v20 = vld [vmem:[#allocation8 + $0x94] sm:$0xf0]  ;;  %v1093_v21 = vld [vmem:[#allocation8 + $0x14] sm:$0xf]  ;;  %v845_v22 = vld [vmem:[#allocation8 + $0x18] sm:$0xf0] }
  0x38   :  { %453 = vmatpush.bf16.msrb.mxu1 %v936_v60  ;;  %v908_v23 = vor.u32 %v1110_v20, %v907_v18  ;;  %v848_v24 = vor.u32 %v1093_v21, %v845_v22  ;;  %v1109_v25 = vld [vmem:[#allocation8 + $0x94] sm:$0xf]  ;;  %v909_v26 = vld [vmem:[#allocation8 + $0x98] sm:$0xf0]  ;;  %v835_v28 = vld [vmem:[#allocation8] sm:$0xf] }
  0x39   :  { %415 = vmatpush.bf16.msra.mxu2 %v860_v0  ;;  %v912_v27 = vor.u32 %v1109_v25, %v909_v26  ;;  %v1092_v29 = vld [vmem:[#allocation8 + $0x4] sm:$0xf0]  ;;  %v899_v30 = vld [vmem:[#allocation8 + $0x80] sm:$0xf]  ;;  %v1091_v33 = vld [vmem:[#allocation8 + $0x4] sm:$0xf] }
  0x3a   :  { %428 = vmatpush.bf16.msra.mxu3 %v924_v1  ;;  %v836_v31 = vor.u32 %v1092_v29, %v835_v28  ;;  %v1108_v32 = vld [vmem:[#allocation8 + $0x84] sm:$0xf0]  ;;  %v837_v34 = vld [vmem:[#allocation8 + $0x8] sm:$0xf0]  ;;  %v1107_v37 = vld [vmem:[#allocation8 + $0x84] sm:$0xf] }
  0x3b   :  { %441 = vmatpush.bf16.msrb.mxu0 %v864_v6  ;;  %v900_v35 = vor.u32 %v1108_v32, %v899_v30  ;;  %v840_v36 = vor.u32 %v1091_v33, %v837_v34  ;;  %v901_v38 = vld [vmem:[#allocation8 + $0x88] sm:$0xf0]  ;;  %v1138_v40 = vld [vmem:[#allocation11 + $0x78] sm:$0xff]  ;;  %v1137_v42 = vld [vmem:[#allocation11 + $0x70] sm:$0xff]  ;;  %s809_s20 = sshll.u32 %s1534_s11, 4  ;;  %s810_s20 = int_to_ptr.hbm [resolvable:$true] %s809_s20 }
  0x3c   :  { %454 = vmatpush.bf16.msrb.mxu1 %v928_v7  ;;  %v904_v39 = vor.u32 %v1107_v37, %v901_v38  ;;  %v1130_v41 = vld [vmem:[#allocation11 + $0x38] sm:$0xff]  ;;  %v1129_v43 = vld [vmem:[#allocation11 + $0x30] sm:$0xff]  ;;  %v1136_v44 = vld [vmem:[#allocation11 + $0x68] sm:$0xff] }
  0x3d   :  { %416 = vmatpush.bf16.msra.mxu2 %v852_v10  ;;  %v1128_v45 = vld [vmem:[#allocation11 + $0x28] sm:$0xff]  ;;  %v1135_v46 = vld [vmem:[#allocation11 + $0x60] sm:$0xff]  ;;  %v1134_v48 = vld [vmem:[#allocation11 + $0x58] sm:$0xff] }
  0x3e   :  { %429 = vmatpush.bf16.msra.mxu3 %v916_v11  ;;  %v1127_v47 = vld [vmem:[#allocation11 + $0x20] sm:$0xff]  ;;  %v163_v49 = vld [vmem:[#allocation7] sm:$0x3]  ;;  %v1133_v50 = vld [vmem:[#allocation11 + $0x50] sm:$0xff] }
  0x3f   :  { %442 = vmatpush.bf16.msrb.mxu0 %v856_v14  ;;  %v165_v51 = vperm.slane %v163_v49, 0  ;;  %v166_v52 = vperm.slane %v163_v49, 1  ;;  %v1126_v63 = vld [vmem:[#allocation11 + $0x18] sm:$0xff]  ;;  %v1132_v0 = vld [vmem:[#allocation11 + $0x48] sm:$0xff]  ;;  %v1125_v1 = vld [vmem:[#allocation11 + $0x10] sm:$0xff] }
  0x40   :  { %455 = vmatpush.bf16.msrb.mxu1 %v920_v15  ;;  %v1131_v2 = vld [vmem:[#allocation11 + $0x40] sm:$0xff]  ;;  %v1124_v3 = vld [vmem:[#allocation11 + $0x8] sm:$0xff]  ;;  %v1146_v5 = vld [vmem:[#allocation13 + $0x38] sm:$0xff] }
  0x41   :  { %417 = vmatpush.bf16.msra.mxu2 %v844_v19  ;;  %v1123_v4 = vld [vmem:[#allocation11] sm:$0xff]  ;;  %v1145_v6 = vld [vmem:[#allocation13 + $0x30] sm:$0xff]  ;;  %v1144_v7 = vld [vmem:[#allocation13 + $0x28] sm:$0xff] }
  0x42   :  { %430 = vmatpush.bf16.msra.mxu3 %v908_v23  ;;  %v1143_v8 = vld [vmem:[#allocation13 + $0x20] sm:$0xff]  ;;  %v245_v9 = vld [vmem:[#allocation10] sm:$0x3]  ;;  %v1141_v29 = vld [vmem:[#allocation13 + $0x10] sm:$0xff] }
  0x43   :  { %443 = vmatpush.bf16.msrb.mxu0 %v848_v24  ;;  %v248_v10 = vperm.slane %v245_v9, 1  ;;  %v247_v15 = vperm.slane %v245_v9, 0  ;;  %v1142_v28 = vld [vmem:[#allocation13 + $0x18] sm:$0xff]  ;;  %v1140_v30 = vld [vmem:[#allocation13 + $0x8] sm:$0xff]  ;;  %v1153_v33 = vld [vmem:[#allocation14 + $0x30] sm:$0xff] }
  0x44   :  { %456 = vmatpush.bf16.msrb.mxu1 %v912_v27  ;;  %v1154_v32 = vld [vmem:[#allocation14 + $0x38] sm:$0xff]  ;;  %v1152_v34 = vld [vmem:[#allocation14 + $0x28] sm:$0xff]  ;;  %v1149_v38 = vld [vmem:[#allocation14 + $0x10] sm:$0xff] }
  0x45   :  { %418 = vmatpush.bf16.msra.mxu2 %v836_v31  ;;  %v1139_v31 = vld [vmem:[#allocation13] sm:$0xff] }
  0x46   :  { %431 = vmatpush.bf16.msra.mxu3 %v900_v35  ;;  %v1151_v35 = vld [vmem:[#allocation14 + $0x20] sm:$0xff] }
  0x47   :  { %444 = vmatpush.bf16.msrb.mxu0 %v840_v36  ;;  %v1150_v36 = vld [vmem:[#allocation14 + $0x18] sm:$0xff]  ;;  %v1169_v49 = vld [vmem:[%s1531_s8] ss:$0 sm:$0xff]  ;;  %s1415_s8 = smov [#allocation16]  }
  0x48   :  { %457 = vmatpush.bf16.msrb.mxu1 %v904_v39  ;;  %v1168_v39 = vld [vmem:[%s1529_s6] ss:$0 sm:$0xff]  ;;  %s807_s18 = sshll.u32 %s1415_s8, 4  ;;  %s808_s18 = int_to_ptr.vmem [resolvable:$true] %s807_s18 }
  0x49   :  { %599 = vmatpush.bf16.msrb.mxu2 %v1130_v41 }
  0x4a   :  { %612 = vmatpush.bf16.msrb.mxu3 %v1138_v40 }
  0x4b   :  { %695 = vmatpush.bf16.msra.mxu0 %v1146_v5 }
  0x4c   :  { %778 = vmatpush.bf16.msra.mxu1 %v1154_v32 }
  0x4d   :  { %600 = vmatpush.bf16.msrb.mxu2 %v1129_v43 }
  0x4e   :  { %613 = vmatpush.bf16.msrb.mxu3 %v1137_v42 }
  0x4f   :  { %696 = vmatpush.bf16.msra.mxu0 %v1145_v6 }
  0x50   :  { %779 = vmatpush.bf16.msra.mxu1 %v1153_v33 }
  0x51   :  { %601 = vmatpush.bf16.msrb.mxu2 %v1128_v45 }
  0x52   :  { %614 = vmatpush.bf16.msrb.mxu3 %v1136_v44 }
  0x53   :  { %697 = vmatpush.bf16.msra.mxu0 %v1144_v7 }
  0x54   :  { %780 = vmatpush.bf16.msra.mxu1 %v1152_v34 }
  0x55   :  { %602 = vmatpush.bf16.msrb.mxu2 %v1127_v47  ;;  %v1148_v47 = vld [vmem:[#allocation14 + $0x8] sm:$0xff] }
  0x56   :  { %615 = vmatpush.bf16.msrb.mxu3 %v1135_v46 }
  0x57   :  { %698 = vmatpush.bf16.msra.mxu0 %v1143_v8 }
  0x58   :  { %781 = vmatpush.bf16.msra.mxu1 %v1151_v35 }
  0x59   :  { %603 = vmatpush.bf16.msrb.mxu2 %v1126_v63 }
  0x5a   :  { %616 = vmatpush.bf16.msrb.mxu3 %v1134_v48  ;;  %v1147_v48 = vld [vmem:[#allocation14] sm:$0xff] }
  0x5b   :  { %699 = vmatpush.bf16.msra.mxu0 %v1142_v28 }
  0x5c   :  { %782 = vmatpush.bf16.msra.mxu1 %v1150_v36 }
  0x5d   :  { %604 = vmatpush.bf16.msrb.mxu2 %v1125_v1 }
  0x5e   :  { %617 = vmatpush.bf16.msrb.mxu3 %v1133_v50 }
  0x5f   :  { %700 = vmatpush.bf16.msra.mxu0 %v1141_v29 }
  0x60   :  { %783 = vmatpush.bf16.msra.mxu1 %v1149_v38 }
  0x61   :  { %605 = vmatpush.bf16.msrb.mxu2 %v1124_v3 }
  0x62   :  { %618 = vmatpush.bf16.msrb.mxu3 %v1132_v0 }
  0x63   :  { %701 = vmatpush.bf16.msra.mxu0 %v1140_v30 }
  0x64   :  { %784 = vmatpush.bf16.msra.mxu1 %v1148_v47 }
  0x65   :  { %606 = vmatpush.bf16.msrb.mxu2 %v1123_v4 }
  0x66   :  { %619 = vmatpush.bf16.msrb.mxu3 %v1131_v2 }
  0x67   :  { %702 = vmatpush.bf16.msra.mxu0 %v1139_v31 }
  0x68   :  { %785 = vmatpush.bf16.msra.mxu1 %v1147_v48 }
  0xa7   :  { %v192_v53 = vpop.f32.mrf.mxu0 }
  0xa8   :  { %v193_v54 = vadd.f32 %v192_v53, %v165_v51  ;;  %v205_v55 = vpop.f32.mrf.mxu1 }
  0xa9   :  { %v206_v56 = vadd.f32 %v205_v55, %v166_v52  ;;  %v1170_v55 = vld [vmem:[%s1533_s10] ss:$0 sm:$0xff] }
  0xaa   :  { %v209_v57 = vmax.f32 %v193_v54, 0.0 }
  0xab   :  { %v210_v58 = vmax.f32 %v206_v56, 0.0 }
  0xac   :  { %v211_v59 = vpack.c.bf16 %v209_v57, %v209_v57 }
  0xad   :  { %v212_v60 = vpack.c.bf16 %v210_v58, %v210_v58 }
  0xae   :  { %419 = vmatmul.bf16.vlgmr.msra.gmra.mxu2 %v211_v59  ;;  %445 = vmatmul.bf16.vlgmr.msrb.gmra.mxu0 %v211_v59 }
  0xaf   :  { %432 = vmatmul.bf16.vlgmr.msra.gmra.mxu3 %v212_v60  ;;  %458 = vmatmul.bf16.vlgmr.msrb.gmra.mxu1 %v212_v60  ;;  %v194_v61 = vpop.f32.mrf.mxu0 }
  0xb0   :  { %v207_v62 = vpop.f32.mrf.mxu1 }
 0x12b   :  { %v446_v11 = vpop.f32.mrf.mxu0 }
 0x12c   :  { %v447_v12 = vadd.f32 %v446_v11, %v248_v10  ;;  %v459_v13 = vpop.f32.mrf.mxu1 }
 0x12e   :  { %v460_v14 = vadd.f32 %v459_v13, %v447_v12 }
 0x130   :  { %v464_v16 = vmax.f32 %v460_v14, 0.0 }
 0x131   :  { %v420_v17 = vpop.f32.mrf.mxu2 }
 0x132   :  { %v466_v18 = vpack.c.bf16 %v464_v16, %v464_v16  ;;  %v421_v19 = vadd.f32 %v420_v17, %v247_v15  ;;  %v433_v20 = vpop.f32.mrf.mxu3 }
 0x133   :  { %v448_v21 = vpop.f32.mrf.mxu0 }
 0x134   :  { %v434_v22 = vadd.f32 %v433_v20, %v421_v19  ;;  %v461_v23 = vpop.f32.mrf.mxu1  ;;  %620 = vmatmul.bf16.vlgmr.msrb.gmra.mxu3 %v466_v18 }
 0x136   :  { %v463_v24 = vmax.f32 %v434_v22, 0.0 }
 0x138   :  { %v465_v25 = vpack.c.bf16 %v463_v24, %v463_v24 }
 0x139   :  { %v422_v26 = vpop.f32.mrf.mxu2 }
 0x13a   :  { %v435_v27 = vpop.f32.mrf.mxu3  ;;  %607 = vmatmul.bf16.vlgmr.msrb.gmra.mxu2 %v465_v25 }
 0x1b7   :  { %v621_v37 = vpop.f32.mrf.mxu3 }
 0x1bd   :  { %v608_v40 = vpop.f32.mrf.mxu2 }
 0x1be   :  { %v609_v41 = vadd.f32 %v1168_v39, %v608_v40 }
 0x1bf   :  { %v623_v42 = vpop.f32.mrf.mxu3 }
 0x1c0   :  { %v622_v43 = vadd.f32 %v621_v37, %v609_v41 }
 0x1c2   :  { %v625_v44 = vmax.f32 %v622_v43, 0.0 }
 0x1c4   :  { %v626_v45 = vpack.c.bf16 %v625_v44, %v625_v44 }
 0x1c5   :  { %v610_v46 = vpop.f32.mrf.mxu2 }
 0x1c6   :  { %703 = vmatmul.bf16.vlgmr.msra.gmra.mxu0 %v626_v45 }
 0x243   :  { %v704_v50 = vpop.f32.mrf.mxu0 }
 0x244   :  { %v705_v51 = vadd.f32 %v1169_v49, %v704_v50 }
 0x246   :  { %v708_v52 = vmax.f32 %v705_v51, 0.0 }
 0x248   :  { %v709_v53 = vpack.c.bf16 %v708_v52, %v708_v52 }
 0x24a   :  { %786 = vmatmul.bf16.vlgmr.msra.gmra.mxu1 %v709_v53 }
 0x24b   :  { %v706_v54 = vpop.f32.mrf.mxu0 }
 0x2c7   :  { %v787_v56 = vpop.f32.mrf.mxu1 }
 0x2c8   :  { %v788_v57 = vadd.f32 %v1170_v55, %v787_v56 }
 0x2ca   :  { %791 = vmax.xlane.f32.xlu0 %v788_v57 }
 0x2cf   :  { %v789_v58 = vpop.f32.mrf.mxu1 }
 0x33d   :  { %v792_v59 = vpop.xlane.xlu0 %791 }
 0x33e   :  { %v793_v60 = vsub.f32 %v788_v57, %v792_v59 }
 0x340   :  { %v794_v61 = vmul.f32 1.442695, %v793_v60 }
 0x342   :  { %1171 = vpow2.f32 %v794_v61 }
 0x348   :  { %v1172_v62 = vpop.eup %1171 }
 0x349   :  { %796 = vadd.xlane.f32.xlu0 %v1172_v62 }
 0x3bc   :  { %v797_v63 = vpop.xlane.xlu0 %796 }
 0x3bd   :  { %1173 = vlog2.f32 %v797_v63 }
 0x3c3   :  { %v1174_v0 = vpop.eup %1173 }
 0x3c4   :  { %v799_v1 = vmul.f32 0.6931472, %v1174_v0 }
 0x3c6   :  { %v800_v2 = vsub.f32 %v793_v60, %v799_v1 }
 0x3c8   :  { %801 = vst [vmem:[#allocation16] sm:$0xff] %v800_v2 }
 0x3c9   :  { %812 = dma.vmem_to_hbm [thread:$0]  %s808_s18, 128, %s810_s20, [#allocation4]  }
 0x3ca   :  { %1401 = dma.done.wait [#allocation4], 128  }
 0x3cb   :  { %1402 = vsyncadd [#allocation4], 4294967168 }
 0x3cc   :  { %817 = vsyncpa [#allocation3], 1 }
 0x3cd   :  { %818 = vsyncpa [#allocation6], 1 }
 0x3ce   :  { %819 = vsyncpa [#allocation9], 1 }
 0x3cf   :  { %820 = vsyncpa [#allocation12], 1 }
 0x3d0   :  { %821 = vsyncpa [#allocation15], 1 }
 0x3d1   :  { %822 = vsyncpa [#allocation4], 1 }

</bundles_post_ra>
